<compile_context>
chip_gen: v6e
topology: v6e:2x2x1
jax: 0.10.0
libtpu: 0.0.40
codegen_flags: <defaults>
</compile_context>

<pallas_src>
import jax
import jax.numpy as jnp
import numpy as np
from jax import lax
from jax.experimental import pallas as pl
from jax.experimental.pallas import tpu as pltpu

LANES = 128


def lovasz_kernel(gts_ref, err_ref, gt_ref, out_ref, carry_ref):
    """One (BR, 128) block of the error-sorted stream.

    gts_ref   : (1, 1)  f32  total number of positive (valid) labels
    err_ref   : (BR, L) f32  descending-sorted hinge errors (-inf marks pad/ignored)
    gt_ref    : (BR, L) f32  labels permuted by the same sort
    out_ref   : (1, 1)  f32  loss accumulator (resident across the grid)
    carry_ref : (1, 1)  f32  running cumsum(gt) over all previous blocks
    """
    BR, L = err_ref.shape
    b = pl.program_id(0)

    @pl.when(b == 0)
    def _():
        out_ref[...] = jnp.zeros_like(out_ref)
        carry_ref[...] = jnp.zeros_like(carry_ref)

    err = err_ref[...]
    valid_b = err > -jnp.inf          # pad / ignored entries were pushed to the tail as -inf
    valid = valid_b.astype(jnp.float32)
    gt = gt_ref[...] * valid          # 0/1 ground truth, masked

    gts = gts_ref[...]                # (1, 1) total positives
    c0 = carry_ref[...]               # (1, 1) cumsum(gt) before this block

    row = lax.broadcasted_iota(jnp.int32, (BR, L), 0)
    col = lax.broadcasted_iota(jnp.int32, (BR, L), 1)
    flat = (b * BR + row) * L + col   # global position in sorted order

    # Inclusive cumsum of gt along the flattened (sorted) order:
    #   within-row : (BR,L) @ upper-triangular (L,L) on the MXU (bf16 operands are
    #                exact for 0/1 data; accumulation is f32)
    #   across rows: small constant-size strictly-lower-triangular (BR,BR) matmul
    #   across blocks: scalar carry in VMEM scratch.
    tri = (lax.broadcasted_iota(jnp.int32, (L, L), 0)
           <= lax.broadcasted_iota(jnp.int32, (L, L), 1)).astype(jnp.bfloat16)
    strict = (lax.broadcasted_iota(jnp.int32, (BR, BR), 1)
              < lax.broadcasted_iota(jnp.int32, (BR, BR), 0)).astype(jnp.float32)

    cg_row = jnp.dot(gt.astype(jnp.bfloat16), tri,
                     preferred_element_type=jnp.float32)               # (BR, L)
    pre_g = jnp.sum(jnp.dot(strict, gt, preferred_element_type=jnp.float32),
                    axis=1, keepdims=True)                             # (BR, 1)

    C = cg_row + pre_g + c0           # cumsum(gt_sorted), inclusive
    # cumsum(1) is analytic: valid entries occupy the first n sorted positions.
    # (exact for P < 2^24; beyond that an f32 cumsum would be inexact anyway)
    E = (flat + 1).astype(jnp.float32)

    intersection = gts - C
    union = gts + (E - C)             # >= 1 everywhere (E >= 1, C <= gts) -> no NaN
    jaccard = 1.0 - intersection * pl.reciprocal(union, approx=False)

    # grad[i] = jaccard[i] - jaccard[i-1], with jaccard[-1] := 0
    prev_in_row = pltpu.roll(jaccard, shift=1, axis=1)
    # jaccard at the end of the previous row, recomputed analytically from the row
    # prefixes (this also covers the block boundary, so no extra carried scalar).
    row1 = lax.broadcasted_iota(jnp.int32, (BR, 1), 0)
    e_prev = ((b * BR + row1) * L).astype(jnp.float32)   # elements before this row
    c_prev = pre_g + c0
    union_prev = jnp.maximum(gts + (e_prev - c_prev), 1.0)   # clamp only hits flat == 0
    prev_row_end = 1.0 - (gts - c_prev) * pl.reciprocal(union_prev, approx=False)
    prev = jnp.where(col == 0, prev_row_end, prev_in_row)
    prev = jnp.where(flat == 0, 0.0, prev)
    grad = jaccard - prev

    # elu(x) + 1 == x + 1 (x > 0) else exp(x); mask the -inf tail before exp.
    err_m = jnp.where(valid_b, err, 0.0)
    f = jnp.where(err_m > 0.0, err_m + 1.0, jnp.exp(err_m))

    terms = f * grad * valid
    out_ref[...] += jnp.sum(jnp.sum(terms, axis=1, keepdims=True),
                            axis=0, keepdims=True)
    carry_ref[...] = c0 + jnp.sum(jnp.sum(gt, axis=1, keepdims=True),
                                  axis=0, keepdims=True)


def lovasz_loss(logits, labels, ignore_index=None):
    """Pallas implementation of LovaszLoss.forward (binary Lovasz hinge)."""
    logits_f = logits.reshape(-1).astype(jnp.float32)
    labels_f = labels.reshape(-1).astype(jnp.float32)
    P = logits_f.shape[0]

    if ignore_index is not None:
        valid = labels_f != jnp.float32(ignore_index)
    else:
        valid = jnp.ones((P,), dtype=bool)

    # Elementwise hinge errors in plain JAX — XLA fuses this with the mask/sort.
    errors = 1.0 - logits_f * (2.0 * labels_f - 1.0)
    errors = jnp.where(valid, errors, -jnp.inf)      # invalid entries sort to the tail
    gt = jnp.where(valid, labels_f, 0.0)
    gts = jnp.sum(gt).reshape(1, 1)                  # total positives, passed to the kernel

    # Rows per block: big enough to amortize per-grid-step overhead, small enough that
    # padding and VMEM stay bounded (each operand block is BR x 128 f32).
    r_needed = -(-P // LANES)
    BR = 8
    for cand in (256, 128, 64, 32, 16, 8):
        if r_needed >= 2 * cand:
            BR = cand
            break
    blk = BR * LANES
    Ppad = -(-P // blk) * blk
    pad = Ppad - P
    errors = jnp.pad(errors, (0, pad), constant_values=-jnp.inf)
    gt = jnp.pad(gt, (0, pad), constant_values=0.0)

    # Global descending sort, carrying labels along in one fused lax.sort.
    # TODO(synk): the data-dependent global sort has no clean Pallas equivalent.
    neg_sorted, gt_sorted = lax.sort((-errors, gt), num_keys=1)
    R = Ppad // LANES
    err_sorted = (-neg_sorted).reshape(R, LANES)
    gt_sorted = gt_sorted.reshape(R, LANES)

    nb = R // BR
    loss = pl.pallas_call(
        lovasz_kernel,
        out_shape=jax.ShapeDtypeStruct((1, 1), jnp.float32),
        grid_spec=pltpu.PrefetchScalarGridSpec(
            num_scalar_prefetch=0,
            grid=(nb,),
            in_specs=[
                pl.BlockSpec((1, 1), lambda b: (0, 0)),         # gts (resident)
                pl.BlockSpec((BR, LANES), lambda b: (b, 0)),    # sorted errors
                pl.BlockSpec((BR, LANES), lambda b: (b, 0)),    # sorted labels
            ],
            out_specs=pl.BlockSpec((1, 1), lambda b: (0, 0)),   # loss accumulator
            scratch_shapes=[pltpu.VMEM((1, 1), jnp.float32)],   # running cumsum carry
        ),
        compiler_params=pltpu.CompilerParams(
            dimension_semantics=("arbitrary",)),                # sequential carried scan
    )(gts, err_sorted, gt_sorted)
    return loss[0, 0]


def lovasz_ref(logits, labels):
    """Pure-JAX reference replicating the PyTorch semantics (ignore_index=None)."""
    lg = logits.reshape(-1).astype(jnp.float32)
    lb = labels.reshape(-1).astype(jnp.float32)
    errors = 1.0 - lg * (2.0 * lb - 1.0)
    perm = jnp.argsort(-errors)
    errs = errors[perm]
    gt_sorted = lb[perm]
    gts = gt_sorted.sum()
    inter = gts - jnp.cumsum(gt_sorted)
    union = gts + jnp.cumsum(1.0 - gt_sorted)
    jac = 1.0 - inter / union
    jac = jnp.concatenate([jac[:1], jac[1:] - jac[:-1]])
    return jnp.dot(jax.nn.elu(errs) + 1.0, jac)


if __name__ == "__main__":
    key = jax.random.PRNGKey(0)
    k1, k2, k3, k4 = jax.random.split(key, 4)

    # NCHW inputs, as a segmentation head would produce.
    logits = jax.random.normal(k1, (2, 4, 16, 16), dtype=jnp.float32)
    labels = (jax.random.uniform(k2, (2, 4, 16, 16)) > 0.5).astype(jnp.float32)
    loss = jax.block_until_ready(lovasz_loss(logits, labels))   # ignore_index=None default
    ref = lovasz_ref(logits, labels)
    np.testing.assert_allclose(np.asarray(loss), np.asarray(ref), rtol=1e-4, atol=1e-4)

    # A second, non-multiple-of-1024 size exercising padding + the cross-block carry.
    logits2 = jax.random.normal(k3, (1, 1, 40, 52), dtype=jnp.float32)
    labels2 = (jax.random.uniform(k4, (1, 1, 40, 52)) > 0.5).astype(jnp.float32)
    loss2 = jax.block_until_ready(lovasz_loss(logits2, labels2))
    ref2 = lovasz_ref(logits2, labels2)
    np.testing.assert_allclose(np.asarray(loss2), np.asarray(ref2), rtol=1e-4, atol=1e-4)

    print("KERNEL_OK")
</pallas_src>

<mosaic_0001>
module attributes {stable_mosaic.version = 11 : i64} {
  func.func @lovasz_kernel(%arg0: i32, %arg1: memref<1x1xf32, #tpu.memory_space<vmem>>, %arg2: memref<8x128xf32, #tpu.memory_space<vmem>>, %arg3: memref<8x128xf32, #tpu.memory_space<vmem>>, %arg4: memref<1x1xf32, #tpu.memory_space<vmem>>, %arg5: memref<1x1xf32, #tpu.memory_space<vmem>>) attributes {dimension_semantics = [#tpu.dimension_semantics<arbitrary>], iteration_bounds = array<i64: 2>, scalar_prefetch = 0 : i64, scratch_operands = 1 : i64, tpu.core_type = #tpu.core_type<tc>, window_params = [{pipeline_mode = #tpu.pipeline_mode<synchronous>, transform_indices = @transform_0, window_bounds = array<i64: 1, 1>}, {transform_indices = @transform_1, window_bounds = array<i64: 8, 128>}, {transform_indices = @transform_2, window_bounds = array<i64: 8, 128>}, {pipeline_mode = #tpu.pipeline_mode<synchronous>, transform_indices = @transform_3, window_bounds = array<i64: 1, 1>}]} {
    %c0_i32 = arith.constant 0 : i32
    %0 = arith.cmpi eq, %arg0, %c0_i32 : i32
    %1 = arith.extui %0 : i1 to i32
    %c0_i32_0 = arith.constant 0 : i32
    %2 = arith.cmpi ne, %1, %c0_i32_0 : i32
    scf.if %2 {
      %cst_33 = arith.constant 0.000000e+00 : f32
      %106 = vector.broadcast %cst_33 : f32 to vector<1x1xf32>
      %c0_34 = arith.constant 0 : index
      %c0_35 = arith.constant 0 : index
      %107 = vector.load %arg4[%c0_34, %c0_35] : memref<1x1xf32, #tpu.memory_space<vmem>>, vector<1x1xf32>
      tpu.vector_store %arg4[%c0_34, %c0_35], %106 {strides = array<i32>} : memref<1x1xf32, #tpu.memory_space<vmem>>, vector<1x1xf32>,
      %cst_36 = arith.constant 0.000000e+00 : f32
      %108 = vector.broadcast %cst_36 : f32 to vector<1x1xf32>
      %c0_37 = arith.constant 0 : index
      %c0_38 = arith.constant 0 : index
      %109 = vector.load %arg5[%c0_37, %c0_38] : memref<1x1xf32, #tpu.memory_space<vmem>>, vector<1x1xf32>
      tpu.vector_store %arg5[%c0_37, %c0_38], %108 {strides = array<i32>} : memref<1x1xf32, #tpu.memory_space<vmem>>, vector<1x1xf32>,
    } else {
    }
    %c0 = arith.constant 0 : index
    %c0_1 = arith.constant 0 : index
    %3 = vector.load %arg2[%c0, %c0_1] : memref<8x128xf32, #tpu.memory_space<vmem>>, vector<8x128xf32>
    %cst = arith.constant 0xFF800000 : f32
    %4 = vector.broadcast %cst : f32 to vector<8x128xf32>
    %5 = arith.cmpf ogt, %3, %4 : vector<8x128xf32>
    %6 = arith.extui %5 : vector<8x128xi1> to vector<8x128xi32>
    %7 = arith.sitofp %6 : vector<8x128xi32> to vector<8x128xf32>
    %c0_2 = arith.constant 0 : index
    %c0_3 = arith.constant 0 : index
    %8 = vector.load %arg3[%c0_2, %c0_3] : memref<8x128xf32, #tpu.memory_space<vmem>>, vector<8x128xf32>
    %9 = arith.mulf %8, %7 : vector<8x128xf32>
    %c0_4 = arith.constant 0 : index
    %c0_5 = arith.constant 0 : index
    %10 = vector.load %arg1[%c0_4, %c0_5] : memref<1x1xf32, #tpu.memory_space<vmem>>, vector<1x1xf32>
    %c0_6 = arith.constant 0 : index
    %c0_7 = arith.constant 0 : index
    %11 = vector.load %arg5[%c0_6, %c0_7] : memref<1x1xf32, #tpu.memory_space<vmem>>, vector<1x1xf32>
    %12 = tpu.iota {dimensions = array<i32: 0>} : vector<8x128xi32>
    %13 = tpu.iota {dimensions = array<i32: 1>} : vector<8x128xi32>
    %c8_i32 = arith.constant 8 : i32
    %14 = arith.muli %arg0, %c8_i32 : i32
    %15 = vector.broadcast %14 : i32 to vector<8x128xi32>
    %16 = arith.addi %15, %12 : vector<8x128xi32>
    %c128_i32 = arith.constant 128 : i32
    %17 = vector.broadcast %c128_i32 : i32 to vector<8x128xi32>
    %18 = arith.muli %16, %17 : vector<8x128xi32>
    %19 = arith.addi %18, %13 : vector<8x128xi32>
    %20 = tpu.iota {dimensions = array<i32: 0>} : vector<128x128xi32>
    %21 = tpu.iota {dimensions = array<i32: 1>} : vector<128x128xi32>
    %22 = arith.cmpi sle, %20, %21 : vector<128x128xi32>
    %23 = arith.extui %22 : vector<128x128xi1> to vector<128x128xi32>
    %24 = arith.sitofp %23 : vector<128x128xi32> to vector<128x128xf32>
    %25 = arith.truncf %24 : vector<128x128xf32> to vector<128x128xbf16>
    %26 = tpu.iota {dimensions = array<i32: 1>} : vector<8x8xi32>
    %27 = tpu.iota {dimensions = array<i32: 0>} : vector<8x8xi32>
    %28 = arith.cmpi slt, %26, %27 : vector<8x8xi32>
    %29 = arith.extui %28 : vector<8x8xi1> to vector<8x8xi32>
    %30 = arith.sitofp %29 : vector<8x8xi32> to vector<8x8xf32>
    %31 = arith.truncf %9 : vector<8x128xf32> to vector<8x128xbf16>
    %cst_8 = arith.constant dense<0.000000e+00> : vector<8x128xf32>
    %32 = tpu.matmul %31, %25, %cst_8 {dimension_numbers = #tpu.dot_dimension_numbers<[1], [0], [0], [1], [0, 0, 1, 1], [], []>} : vector<8x128xbf16>, vector<128x128xbf16>, vector<8x128xf32> -> vector<8x128xf32>
    %cst_9 = arith.constant dense<0.000000e+00> : vector<8x128xf32>
    %33 = tpu.matmul %30, %9, %cst_9 {dimension_numbers = #tpu.dot_dimension_numbers<[1], [0], [0], [1], [0, 0, 1, 1], [], []>} : vector<8x8xf32>, vector<8x128xf32>, vector<8x128xf32> -> vector<8x128xf32>
    %cst_10 = arith.constant dense<0.000000e+00> : vector<8xf32>
    %34 = vector.multi_reduction <add>, %33, %cst_10 [1] : vector<8x128xf32> to vector<8xf32>
    %35 = vector.shape_cast %34 : vector<8xf32> to vector<8x1xf32>
    %36 = vector.broadcast %35 : vector<8x1xf32> to vector<8x128xf32>
    %37 = arith.addf %32, %36 : vector<8x128xf32>
    %38 = vector.broadcast %11 : vector<1x1xf32> to vector<8x128xf32>
    %39 = arith.addf %37, %38 : vector<8x128xf32>
    %c1_i32 = arith.constant 1 : i32
    %40 = vector.broadcast %c1_i32 : i32 to vector<8x128xi32>
    %41 = arith.addi %19, %40 : vector<8x128xi32>
    %42 = arith.sitofp %41 : vector<8x128xi32> to vector<8x128xf32>
    %43 = vector.broadcast %10 : vector<1x1xf32> to vector<8x128xf32>
    %44 = arith.subf %43, %39 : vector<8x128xf32>
    %45 = arith.subf %42, %39 : vector<8x128xf32>
    %46 = vector.broadcast %10 : vector<1x1xf32> to vector<8x128xf32>
    %47 = arith.addf %46, %45 : vector<8x128xf32>
    %48 = tpu.reciprocal %47 : vector<8x128xf32> -> vector<8x128xf32>
    %49 = arith.mulf %44, %48 : vector<8x128xf32>
    %cst_11 = arith.constant 1.000000e+00 : f32
    %50 = vector.broadcast %cst_11 : f32 to vector<8x128xf32>
    %51 = arith.subf %50, %49 : vector<8x128xf32>
    %c1_i32_12 = arith.constant 1 : i32
    %52 = tpu.dynamic_rotate %51 by %c1_i32_12 dim 1 : vector<8x128xf32>, i32 -> vector<8x128xf32>
    %53 = tpu.iota {dimensions = array<i32: 0>} : vector<8x1xi32>
    %c8_i32_13 = arith.constant 8 : i32
    %54 = arith.muli %arg0, %c8_i32_13 : i32
    %55 = vector.broadcast %54 : i32 to vector<8x1xi32>
    %56 = arith.addi %55, %53 : vector<8x1xi32>
    %c128_i32_14 = arith.constant 128 : i32
    %57 = vector.broadcast %c128_i32_14 : i32 to vector<8x1xi32>
    %58 = arith.muli %56, %57 : vector<8x1xi32>
    %59 = arith.sitofp %58 : vector<8x1xi32> to vector<8x1xf32>
    %60 = vector.broadcast %11 : vector<1x1xf32> to vector<8x1xf32>
    %61 = arith.addf %35, %60 : vector<8x1xf32>
    %62 = arith.subf %59, %61 : vector<8x1xf32>
    %63 = vector.broadcast %10 : vector<1x1xf32> to vector<8x1xf32>
    %64 = arith.addf %63, %62 : vector<8x1xf32>
    %cst_15 = arith.constant 1.000000e+00 : f32
    %65 = vector.broadcast %cst_15 : f32 to vector<8x1xf32>
    %66 = arith.maximumf %64, %65 : vector<8x1xf32>
    %67 = vector.broadcast %10 : vector<1x1xf32> to vector<8x1xf32>
    %68 = arith.subf %67, %61 : vector<8x1xf32>
    %69 = tpu.reciprocal %66 : vector<8x1xf32> -> vector<8x1xf32>
    %70 = arith.mulf %68, %69 : vector<8x1xf32>
    %cst_16 = arith.constant 1.000000e+00 : f32
    %71 = vector.broadcast %cst_16 : f32 to vector<8x1xf32>
    %72 = arith.subf %71, %70 : vector<8x1xf32>
    %c0_i32_17 = arith.constant 0 : i32
    %73 = vector.broadcast %c0_i32_17 : i32 to vector<8x128xi32>
    %74 = arith.cmpi eq, %13, %73 : vector<8x128xi32>
    %75 = vector.shape_cast %72 : vector<8x1xf32> to vector<8x1xf32>
    %76 = vector.broadcast %75 : vector<8x1xf32> to vector<8x128xf32>
    %77 = arith.select %74, %76, %52 : vector<8x128xi1>, vector<8x128xf32>
    %c0_i32_18 = arith.constant 0 : i32
    %78 = vector.broadcast %c0_i32_18 : i32 to vector<8x128xi32>
    %79 = arith.cmpi eq, %19, %78 : vector<8x128xi32>
    %cst_19 = arith.constant 0.000000e+00 : f32
    %80 = vector.broadcast %cst_19 : f32 to vector<8x128xf32>
    %81 = arith.select %79, %80, %77 : vector<8x128xi1>, vector<8x128xf32>
    %82 = arith.subf %51, %81 : vector<8x128xf32>
    %cst_20 = arith.constant 0.000000e+00 : f32
    %83 = vector.broadcast %cst_20 : f32 to vector<8x128xf32>
    %84 = arith.select %5, %3, %83 : vector<8x128xi1>, vector<8x128xf32>
    %cst_21 = arith.constant 0.000000e+00 : f32
    %85 = vector.broadcast %cst_21 : f32 to vector<8x128xf32>
    %86 = arith.cmpf ogt, %84, %85 : vector<8x128xf32>
    %cst_22 = arith.constant 1.000000e+00 : f32
    %87 = vector.broadcast %cst_22 : f32 to vector<8x128xf32>
    %88 = arith.addf %84, %87 : vector<8x128xf32>
    %89 = math.exp %84 : vector<8x128xf32>
    %90 = arith.select %86, %88, %89 : vector<8x128xi1>, vector<8x128xf32>
    %91 = arith.mulf %90, %82 : vector<8x128xf32>
    %92 = arith.mulf %91, %7 : vector<8x128xf32>
    %c0_23 = arith.constant 0 : index
    %c0_24 = arith.constant 0 : index
    %93 = vector.load %arg4[%c0_23, %c0_24] : memref<1x1xf32, #tpu.memory_space<vmem>>, vector<1x1xf32>
    %cst_25 = arith.constant dense<0.000000e+00> : vector<8xf32>
    %94 = vector.multi_reduction <add>, %92, %cst_25 [1] : vector<8x128xf32> to vector<8xf32>
    %95 = vector.shape_cast %94 : vector<8xf32> to vector<8x1xf32>
    %cst_26 = arith.constant dense<0.000000e+00> : vector<1xf32>
    %96 = vector.multi_reduction <add>, %95, %cst_26 [0] : vector<8x1xf32> to vector<1xf32>
    %97 = vector.shape_cast %96 : vector<1xf32> to vector<1x1xf32>
    %98 = arith.addf %93, %97 : vector<1x1xf32>
    %c0_27 = arith.constant 0 : index
    %c0_28 = arith.constant 0 : index
    %99 = vector.load %arg4[%c0_27, %c0_28] : memref<1x1xf32, #tpu.memory_space<vmem>>, vector<1x1xf32>
    tpu.vector_store %arg4[%c0_27, %c0_28], %98 {strides = array<i32>} : memref<1x1xf32, #tpu.memory_space<vmem>>, vector<1x1xf32>,
    %cst_29 = arith.constant dense<0.000000e+00> : vector<8xf32>
    %100 = vector.multi_reduction <add>, %9, %cst_29 [1] : vector<8x128xf32> to vector<8xf32>
    %101 = vector.shape_cast %100 : vector<8xf32> to vector<8x1xf32>
    %cst_30 = arith.constant dense<0.000000e+00> : vector<1xf32>
    %102 = vector.multi_reduction <add>, %101, %cst_30 [0] : vector<8x1xf32> to vector<1xf32>
    %103 = vector.shape_cast %102 : vector<1xf32> to vector<1x1xf32>
    %104 = arith.addf %11, %103 : vector<1x1xf32>
    %c0_31 = arith.constant 0 : index
    %c0_32 = arith.constant 0 : index
    %105 = vector.load %arg5[%c0_31, %c0_32] : memref<1x1xf32, #tpu.memory_space<vmem>>, vector<1x1xf32>
    tpu.vector_store %arg5[%c0_31, %c0_32], %104 {strides = array<i32>} : memref<1x1xf32, #tpu.memory_space<vmem>>, vector<1x1xf32>,
    return
  }
  func.func @transform_0(%arg0: i32) -> (i32, i32) {
    %c0_i32 = arith.constant 0 : i32
    %c0_i32_0 = arith.constant 0 : i32
    %c0_i32_1 = arith.constant 0 : i32
    return %c0_i32, %c0_i32_0 : i32, i32
  }
  func.func @transform_1(%arg0: i32) -> (i32, i32) {
    %c0_i32 = arith.constant 0 : i32
    %c0_i32_0 = arith.constant 0 : i32
    return %arg0, %c0_i32 : i32, i32
  }
  func.func @transform_2(%arg0: i32) -> (i32, i32) {
    %c0_i32 = arith.constant 0 : i32
    %c0_i32_0 = arith.constant 0 : i32
    return %arg0, %c0_i32 : i32, i32
  }
  func.func @transform_3(%arg0: i32) -> (i32, i32) {
    %c0_i32 = arith.constant 0 : i32
    %c0_i32_0 = arith.constant 0 : i32
    %c0_i32_1 = arith.constant 0 : i32
    return %c0_i32, %c0_i32_0 : i32, i32
  }
}

</mosaic_0001>

<bundles_post_ra>
// kernel: tpu_custom_call.1
= control target key start
LH: loop header
LB: loop body
LE: loop exit
PB: predicated region body
PF: predicated region fallthrough
CT: control target
= control target key end

     0   :  { %s1133_s0 = inlined_call_operand.<no memory space> [shape: f32[1,1], index: 0, kind: input, shape index: {}]   ;;  %s1134_s1 = inlined_call_operand.hbm [shape: f32[16,128], index: 1, kind: input, shape index: {}]   ;;  %s1135_s2 = inlined_call_operand.hbm [shape: f32[16,128], index: 2, kind: input, shape index: {}]   ;;  %s1136_s3 = inlined_call_operand.hbm [shape: f32[1,1], index: 3, kind: output, shape index: {}]  }
   0x1   :  { %v8_v0 = vstv %s1133_s0 }
   0x2   :  { %9 = vst [vmem:[#allocation3] sm:$0x1] %v8_v0 }
   0x3   :  { %10 = vsyncpa [#allocation5], 0 }
   0x4   :  { %12 = vsyncpa [#allocation5 + $0x1], 0 }
   0x5   :  { %13 = vsyncpa [#allocation8], 0 }
   0x6   :  { %15 = vsyncpa [#allocation8 + $0x1], 0 }
   0x7   :  { %16 = vsyncpa [#allocation6], 0  ;;  %s898_s14 = smov 0   ;;  %s900_s15 = smov 0  }
   0x8   :  { %s902_s16 = smov 0   ;;  %s904_s17 = smov 0  }
   0x9 LB: > { %s917_s0 = sadd.s32 4294967295, %s864_s17   ;;  %s920_s18 = sadd.s32 1, %s864_s17   ;;  %s864_s17 = sphi %s904_s17, %s1148_s17   ;;  %s860_s16 = sphi %s902_s16, %s1147_s16   ;;  %s856_s15 = sphi %s900_s15, %s1146_s15   ;;  %s852_s14 = sphi %s898_s14, %s1145_s14  }
   0xa   : > { %s47_s19 = ssub.s32 %s864_s17, %s920_s18  ;;  %s50_s20 = sadd.s32 1, %s860_s16 }
   0xb   : > { %p48_p0 = scmp.eq.s32.totalorder %s47_s19, 0  ;;  %p57_p1 = scmp.ne.s32.totalorder %s860_s16, %s856_s15 }
   0xc   : > { %p58_p2 = scmp.eq.s32.totalorder %s864_s17, 0  ;;  %p63_p3 = scmp.ne.s32.totalorder %s856_s15, %s852_s14 }
   0xd   : > { %s930_s21 = scalar_select %p48_p0, %s860_s16, %s50_s20  }
   0xe   : > { %p59_p4 = por %p58_p2, %p57_p1  ;;  %p64_p5 = scmp.eq.s32.totalorder %s917_s0, 0 }
   0xf   : > { %p692_p6 = scmp.lt.s32.totalorder %s864_s17, 2  ;;  %s939_s23 = sand.u32 1, %s860_s16  }
  0x10   : > { %p934_p7 = por %p64_p5, %p63_p3  ;;  %s592_s24 = sshll.u32 %s939_s23, 3 }
  0x11   : > { %s593_s25 = sshll.u32 %s864_s17, 7  ;;  %s141_s29 = scalar_lea.vmem [#allocation4], %s592_s24 }
  0x12   : > { %s1138_s22 = scalar_select %p934_p7, 1, 0 }
  0x13   : > { %s948_s28 = scalar_lea.hbm %s1134_s1, %s593_s25  ;;  %s148_s30 = sshll.u32 %s141_s29, 4  ;;  %s952_s30 = int_to_ptr.vmem [resolvable:$true] %s148_s30 }
  0x14   : > { %p954_p8 = pnand %p692_p6, %p59_p4  ;;  %s138_s5 = scalar_lea.sflag [#allocation5], %s939_s23 }
  0x15   : > { %s742_s6 = scalar_lea.hbm %s948_s28, 128  ;;  %s747_s9 = scalar_lea.hbm %s1134_s1, 256 }
  0x16   : > { %p743_p11 = scmp.ne.s32.totalorder %s948_s28, %s742_s6  ;;  %p744_p12 = pneg %p954_p8 }
  0x17   : > { %p748_p1 = scmp.lt.s32.totalorder %s948_s28, %s1134_s1  ;;  %p749_p2 = scmp.lt.s32.totalorder %s747_s9, %s742_s6 }
  0x18   : > { %p745_p13 = pnand %p744_p12, %p743_p11 }
  0x19   : > { %p750_p3 = por %p749_p2, %p748_p1 }
  0x1a   : > { %p746_p0 = pneg %p745_p13 }
  0x1c   : > { %p751_p4 = pnand %p750_p3, %p746_p0 }
  0x1e   : > { %754 = shalt.err (!%p751_p4)
}
  0x1f   : > { %s755_s12 = scalar_lea.vmem %s952_s30, 128  ;;  %s866_s13 = smov [#allocation4]  }
  0x20   : > { %p756_p5 = scmp.ne.s32.totalorder %s952_s30, %s755_s12  ;;  %s760_s14 = sshll.u32 %s866_s13, 4  ;;  %s761_s14 = int_to_ptr.vmem [resolvable:$false] %s760_s14 }
  0x21   : > { %s762_s19 = scalar_lea.vmem %s761_s14, 256  ;;  %p763_p13 = scmp.lt.s32.totalorder %s952_s30, %s761_s14 }
  0x22   : > { %p758_p6 = pnand %p756_p5, %p744_p12  ;;  %p764_p9 = scmp.lt.s32.totalorder %s762_s19, %s755_s12 }
  0x24   : > { %p759_p11 = pneg %p758_p6  ;;  %p765_p10 = por %p764_p9, %p763_p13 }
  0x26   : > { %p766_p1 = pnand %p765_p10, %p759_p11 }
  0x28   : > { %769 = shalt.err (!%p766_p1)
}
  0x29   : > { %688 = dma.hbm_to_vmem [thread:$0]  (!%p954_p8), %s948_s28, 128, %s952_s30, %s138_s5  }
  0x2a   : > { %p1140_p0 = scmp.lt.s32.totalorder %s864_s17, 3  ;;  %p1141_p2 = scmp.ge.s32.totalorder %s864_s17, 1 }
  0x2b   : > { %s998_s29 = scalar_lea.hbm %s1135_s2, %s593_s25  ;;  %s159_s6 = scalar_lea.vmem [#allocation7], %s592_s24 }
  0x2c   : > { %p989_p3 = pnand %p1141_p2, %p1140_p0  ;;  %s166_s7 = sshll.u32 %s159_s6, 4  ;;  %s167_s7 = int_to_ptr.vmem [resolvable:$true] %s166_s7 }
  0x2d   : > { %s156_s28 = scalar_lea.sflag [#allocation8], %s939_s23  ;;  %s770_s30 = scalar_lea.hbm %s998_s29, 128 }
  0x2e   : > { %s1142_s20 = scalar_select %p989_p3, 1, 0 }
  0x2f   : > { %p771_p9 = scmp.ne.s32.totalorder %s998_s29, %s770_s30  ;;  %s775_s8 = scalar_lea.hbm %s1135_s2, 256 }
  0x30   : > { %p776_p5 = scmp.lt.s32.totalorder %s998_s29, %s1135_s2  ;;  %p777_p6 = scmp.lt.s32.totalorder %s775_s8, %s770_s30 }
  0x31   : > { %p773_p10 = pnand %p771_p9, %p744_p12 }
  0x32   : > { %p778_p11 = por %p777_p6, %p776_p5 }
  0x33   : > { %p774_p4 = pneg %p773_p10 }
  0x35   : > { %p779_p13 = pnand %p778_p11, %p774_p4 }
  0x37   : > { %782 = shalt.err (!%p779_p13)
}
  0x38   : > { %s783_s24 = scalar_lea.vmem %s167_s7, 128  ;;  %s867_s23 = smov [#allocation7]  }
  0x39   : > { %p784_p1 = scmp.ne.s32.totalorder %s167_s7, %s783_s24  ;;  %s788_s10 = sshll.u32 %s867_s23, 4  ;;  %s789_s10 = int_to_ptr.vmem [resolvable:$false] %s788_s10 }
  0x3a   : > { %s790_s11 = scalar_lea.vmem %s789_s10, 256  ;;  %p791_p9 = scmp.lt.s32.totalorder %s167_s7, %s789_s10 }
  0x3b   : > { %p786_p0 = pnand %p784_p1, %p744_p12  ;;  %p792_p10 = scmp.lt.s32.totalorder %s790_s11, %s783_s24 }
  0x3d   : > { %p787_p2 = pneg %p786_p0  ;;  %p793_p7 = por %p792_p10, %p791_p9 }
  0x3f   : > { %p794_p3 = pnand %p793_p7, %p787_p2 }
  0x41   : > { %797 = shalt.err (!%p794_p3)
}
  0x42   : > { %691 = dma.hbm_to_vmem [thread:$0]  (!%p954_p8), %s998_s29, 128, %s167_s7, %s156_s28  }
  0x43   : > { %p1143_p4 = scmp.ne.s32.totalorder %s1142_s20, 0 }
  0x44   : > { %s177_s12 = sand.u32 (!%p1143_p4), 1, %s856_s15   ;;  %p1144_p12 = scmp.ne.s32.totalorder (!%p1143_p4), %s1138_s22, 0 }
  0x45   : > { %175 = sbr.rel (%p1143_p4) target bundleno = 742 (0x2e6), region = 32  ;;  %s597_s13 = sshll.u32 (!%p1143_p4), %s177_s12, 3 }
  0x46   : > { %s178_s14 = scalar_lea.sflag (!%p1143_p4), [#allocation5], %s177_s12  ;;  %s181_s19 = scalar_lea.vmem (!%p1143_p4), [#allocation4], %s597_s13 }
  0x4a   : > { %839 = dma.done.wait (%p1144_p12), %s178_s14, 128  }
  0x4b   : > { %841 = vsyncadd (%p1144_p12), %s178_s14, 4294967168  ;;  %s187_s26 = scalar_lea.sflag [#allocation8], %s177_s12  ;;  %s190_s27 = scalar_lea.vmem [#allocation7], %s597_s13 }
  0x4c   : > { %843 = dma.done.wait (%p1144_p12), %s187_s26, 128  }
  0x4d   : > { %845 = vsyncadd (%p1144_p12), %s187_s26, 4294967168  ;;  %p599_p7 = scmp.ne.s32.totalorder %s917_s0, 0 }
  0x4f   : > { %217 = sbr.rel (%p599_p7) target bundleno = 86 (0x56), region = 44 }
  0x54   : > { %vm218_vm0 = vcmask 0   ;;  %v868_v1 = vmov 0.0  }
  0x55   : > { %219 = vst.msk [vmem:[#allocation9] sm:$0x1] %vm218_vm0, %v868_v1  ;;  %220 = vst.msk [vmem:[#allocation2] sm:$0x1] %vm218_vm0, %v868_v1 }
  0x56 PF: > { %v221_v2 = vld [vmem:[%s181_s19] sm:$0xff]  ;;  %v225_v3 = vld [vmem:[%s190_s27] sm:$0xff]  ;;  %v229_v4 = vlaneseq  ;;  %v869_v5 = vmov 0.0   ;;  %vm870_vm2 = vmmov 0   ;;  %vm313_vm3 = vcmask 64512   ;;  %s601_s22 = sshll.u32 %s917_s0, 3 }
  0x57   : > { %652 = vmatprep.subr.mxu0 %v869_v5  ;;  %vm222_vm1 = vcmp.gt.f32.partialorder %v221_v2, -inf  ;;  %654 = vmatprep.mubr.msk.f32.mxu0 %vm870_vm2, %v869_v5  ;;  %v871_v18 = vmov 1.0|1.0   ;;  %v872_v29 = vmov 0   ;;  %v636_v30 = vld [vmem:[#allocation3] ss:$0 sm:$0xff]  ;;  %v234_v40 = vstv %s601_s22 }
  0x58   : > { %v1036_v6 = vsel %vm222_vm1, 1.0, %v869_v5  ;;  %v1038_v7 = vsel %vm222_vm1, %v221_v2, 0.0  ;;  %v1040_v8 = vshrl.u32 %v229_v4, 7  ;;  %v1042_v9 = vand.u32 127, %v229_v4  ;;  %657 = vmatprep.subr.bf16.mxu1 %v869_v5  ;;  %673 = vmatprep.mubr.msk.bf16.mxu1 %vm870_vm2, %v869_v5  ;;  %s873_s4 = smov 1   ;;  %s874_s20 = smov [#allocation9]  }
  0x59   : > { %v1047_v10 = vmul.f32 %v1036_v6, %v225_v3  ;;  %734 = vset.pattern.permute.xlu0 %v872_v29  ;;  %735 = vset.pattern.permute.xlu1 %v872_v29  ;;  %v482_v2 = vmul.f32 1.442695, %v1038_v7  ;;  %s516_s29 = sshll.u32 %s874_s20, 4  ;;  %p693_p8 = scmp.eq.s32.totalorder %s917_s0, 1  ;;  %s517_s29 = int_to_ptr.vmem [resolvable:$true] %s516_s29 }
  0x5a   : > { %vm309_vm4 = vcmp.lt.s32.totalorder %v1042_v9, %v1040_v8  ;;  %v251_v11 = vadd.s32 112, %v1040_v8  ;;  %v252_v12 = vadd.s32 120, %v1040_v8  ;;  %v249_v13 = vadd.s32 96, %v1040_v8  ;;  %447 = vperm.xlu1 %735, %v636_v30   ;;  %s798_s6 = scalar_lea.vmem %s517_s29, 16  ;;  %s804_s7 = scalar_lea.vmem %s517_s29, 32 }
  0x5b   : > { %653 = vmatpush3.msra.mxu0 %v1047_v10  ;;  %v618_v14 = vsel %vm309_vm4, 1.0, %v869_v5  ;;  %v250_v15 = vadd.s32 104, %v1040_v8  ;;  %v247_v16 = vadd.s32 80, %v1040_v8  ;;  %v248_v17 = vadd.s32 88, %v1040_v8  ;;  %p799_p3 = scmp.ne.s32.totalorder %s517_s29, %s798_s6  ;;  %p805_p11 = scmp.lt.s32.totalorder %s517_s29, %s517_s29 }
  0x5c   : > { %655 = vmatmul.mubr.msk.f32.vlgmr.msra.gmra.mxu0 %vm313_vm3, %v618_v14  ;;  %vm267_vm5 = vcmp.le.s32.totalorder %v251_v11, %v1042_v9  ;;  %vm268_vm6 = vcmp.le.s32.totalorder %v252_v12, %v1042_v9  ;;  %vm265_vm7 = vcmp.le.s32.totalorder %v249_v13, %v1042_v9  ;;  %v245_v19 = vadd.s32 64, %v1040_v8  ;;  %v1095_v34 = vld [vmem:[#allocation2] sm:$0x1]  ;;  %p806_p13 = scmp.lt.s32.totalorder %s804_s7, %s798_s6 }
  0x5d   : > { %vm620_vm8 = vmpackc.low %vm268_vm6, %vm267_vm5  ;;  %vm266_vm9 = vcmp.le.s32.totalorder %v250_v15, %v1042_v9  ;;  %vm263_vm11 = vcmp.le.s32.totalorder %v247_v16, %v1042_v9  ;;  %vm264_vm12 = vcmp.le.s32.totalorder %v248_v17, %v1042_v9  ;;  %v246_v20 = vadd.s32 72, %v1040_v8  ;;  %p800_p5 = pnand %p799_p3, %p693_p8 }
  0x5e   : > { %658 = vmatpush3.bf16.msk.msra.mxu1 %vm620_vm8, %v871_v18  ;;  %vm622_vm10 = vmpackc.low %vm266_vm9, %vm265_vm7  ;;  %vm261_vm14 = vcmp.le.s32.totalorder %v245_v19, %v1042_v9  ;;  %v243_v21 = vadd.s32 48, %v1040_v8  ;;  %v244_v22 = vadd.s32 56, %v1040_v8  ;;  %v241_v23 = vadd.s32 32, %v1040_v8  ;;  %p807_p1 = por %p806_p13, %p805_p11 }
  0x5f   : > { %659 = vmatprep.subr.bf16.mxu1 %v869_v5  ;;  %vm624_vm13 = vmpackc.low %vm264_vm12, %vm263_vm11  ;;  %vm262_vm15 = vcmp.le.s32.totalorder %v246_v20, %v1042_v9  ;;  %v242_v24 = vadd.s32 40, %v1040_v8  ;;  %v239_v25 = vadd.s32 16, %v1040_v8  ;;  %v240_v26 = vadd.s32 24, %v1040_v8  ;;  %p801_p6 = pneg %p800_p5 }
  0x60   : > { %vm626_vm0 = vmpackc.low %vm262_vm15, %vm261_vm14  ;;  %vm259_vm1 = vcmp.le.s32.totalorder %v243_v21, %v1042_v9  ;;  %vm260_vm2 = vcmp.le.s32.totalorder %v244_v22, %v1042_v9  ;;  %vm257_vm4 = vcmp.le.s32.totalorder %v241_v23, %v1042_v9  ;;  %v238_v27 = vadd.s32 8, %v1040_v8 }
  0x61   : > { %vm628_vm3 = vmpackc.low %vm260_vm2, %vm259_vm1  ;;  %vm258_vm5 = vcmp.le.s32.totalorder %v242_v24, %v1042_v9  ;;  %vm255_vm7 = vcmp.le.s32.totalorder %v239_v25, %v1042_v9  ;;  %vm256_vm8 = vcmp.le.s32.totalorder %v240_v26, %v1042_v9  ;;  %v312_v28 = vpack.c.bf16 %v1047_v10, %v1047_v10  ;;  %p808_p0 = pnand %p807_p1, %p801_p6 }
  0x62   : > { %660 = vmatpush3.bf16.msk.msra.mxu1 %vm622_vm10, %v871_v18  ;;  %vm630_vm6 = vmpackc.low %vm258_vm5, %vm257_vm4  ;;  %vm253_vm10 = vcmp.le.s32.totalorder %v1040_v8, %v1042_v9  ;;  %vm254_vm11 = vcmp.le.s32.totalorder %v238_v27, %v1042_v9  ;;  %v432_v33 = vsub.s32 0, %v1040_v8  ;;  %v235_v41 = vadd.s32 %v234_v40, %v1040_v8 }
  0x63   : > { %661 = vmatprep.subr.bf16.mxu1 %v869_v5  ;;  %vm632_vm9 = vmpackc.low %vm256_vm8, %vm255_vm7  ;;  %vm480_vm15 = vcmp.gt.f32.partialorder %v1038_v7, 0.0 }
  0x64   : > { %vm634_vm12 = vmpackc.low %vm254_vm11, %vm253_vm10  ;;  %v433_v35 = vrot.slane %v1095_v34, %v432_v33  ;;  %v236_v42 = vmul.u32 128, %v235_v41 }
  0x66   : > { %662 = vmatpush3.bf16.msk.msra.mxu1 %vm624_vm13, %v871_v18  ;;  %v458_v43 = vcvt.s32.f32 %v236_v42  ;;  %v237_v44 = vadd.s32 %v236_v42, %v1042_v9  ;;  %vm469_vm13 = vcmp.eq.s32.totalorder %v1042_v9, 0 }
  0x67   : > { %663 = vmatprep.subr.bf16.mxu1 %v869_v5 }
  0x68   : > { %v439_v48 = vadd.s32 1, %v237_v44  ;;  %vm476_vm14 = vcmp.eq.s32.totalorder %v237_v44, 0 }
  0x6a   : > { %664 = vmatpush3.bf16.msk.msra.mxu1 %vm626_vm0, %v871_v18  ;;  %v440_v52 = vcvt.s32.f32 %v439_v48  ;;  %vm497_vm0 = vcmask 0  }
  0x6b   : > { %665 = vmatprep.subr.bf16.mxu1 %v869_v5 }
  0x6e   : > { %666 = vmatpush3.bf16.msk.msra.mxu1 %vm628_vm3, %v871_v18 }
  0x6f   : > { %667 = vmatprep.subr.bf16.mxu1 %v869_v5 }
  0x72   : > { %668 = vmatpush3.bf16.msk.msra.mxu1 %vm630_vm6, %v871_v18 }
  0x73   : > { %669 = vmatprep.subr.bf16.mxu1 %v869_v5 }
  0x76   : > { %670 = vmatpush3.bf16.msk.msra.mxu1 %vm632_vm9, %v871_v18 }
  0x77   : > { %671 = vmatprep.subr.bf16.mxu1 %v869_v5  ;;  %v481_v5 = vadd.f32 1.0, %v1038_v7 }
  0x7a   : > { %672 = vmatpush3.bf16.msk.msra.mxu1 %vm634_vm12, %v871_v18 }
  0x7d   : > { %674 = vmatmul.mubr.bf16.vlgmr.msra.gmra.mxu1 %v312_v28  ;;  %v487_v28 = vld [vmem:[#allocation9] sm:$0x1] }
  0xd5   : > { %v448_v56 = vpop.permute.xlu1 %447 }
 0x11c   : > { %v383_v31 = vpop.f32.mrf.mxu0 }
 0x11d   : > { %387 = vadd.xlane.f32.xlu0 %v383_v31 }
 0x11e   : > { %v656_v32 = vpop.f32.mrf.mxu0 }
 0x133   : > { %435 = vperm.xlu0 %734, %v433_v35  }
 0x13d   : > { %v423_v36 = vpop.f32.mrf.mxu1 }
 0x13f   : > { %v675_v37 = vpop.f32.mrf.mxu1 }
 0x141   : > { %v426_v38 = vpop.f32.mrf.mxu1 }
 0x143   : > { %v676_v39 = vpop.f32.mrf.mxu1 }
 0x152   : > { %499 = vadd.xlane.f32.xlu0 %v1047_v10 }
 0x1a6   : > { %v388_v45 = vpop.xlane.xlu0 %387 }
 0x1a7   : > { %v460_v46 = vadd.f32 %v433_v35, %v388_v45  ;;  %v424_v51 = vadd.f32 %v423_v36, %v388_v45 }
 0x1a9   : > { %v461_v47 = vsub.f32 %v458_v43, %v460_v46  ;;  %v465_v58 = vsub.f32 %v636_v30, %v460_v46 }
 0x1ab   : > { %v463_v49 = vadd.f32 %v636_v30, %v461_v47 }
 0x1ad   : > { %v464_v50 = vmax.f32 %v463_v49, 1.0 }
 0x1ae   : > { %v436_v53 = vpop.permute.xlu0 %435 }
 0x1af   : > { %736 = vrcp.f32 %v464_v50  ;;  %v438_v54 = vadd.f32 %v436_v53, %v424_v51 }
 0x1b1   : > { %v451_v55 = vsub.f32 %v440_v52, %v438_v54  ;;  %v450_v62 = vsub.f32 %v448_v56, %v438_v54 }
 0x1b3   : > { %v452_v57 = vadd.f32 %v451_v55, %v448_v56 }
 0x1b5   : > { %738 = vrcp.f32 %v452_v57 }
 0x1b6   : > { %740 = vpow2.f32 %v482_v2 }
 0x1bc   : > { %v737_v59 = vpop.eup %736 }
 0x1bd   : > { %v467_v60 = vmul.f32 %v737_v59, %v465_v58 }
 0x1bf   : > { %v468_v61 = vsub.f32 1.0, %v467_v60 }
 0x1c1   : > { %472 = vperm.xlu1 %735, %v468_v61  }
 0x1c2   : > { %v739_v63 = vpop.eup %738 }
 0x1c3   : > { %v454_v0 = vmul.f32 %v739_v63, %v450_v62  ;;  %v741_v8 = vpop.eup %740 }
 0x1c4   : > { %v484_v14 = vsel %vm480_vm15, %v481_v5, %v741_v8 }
 0x1c5   : > { %v455_v1 = vsub.f32 1.0, %v454_v0 }
 0x1c7   : > { %456 = vrot.lane.b32.xlu1 %v455_v1, %s873_s4 }
 0x1db   : > { %v500_v4 = vpop.xlane.xlu0 %499 }
 0x1dc   : > { %v501_v11 = vrot.slane %v500_v4, 4 }
 0x1de   : > { %v502_v16 = vadd.f32 %v501_v11, %v500_v4 }
 0x1e0   : > { %v503_v19 = vrot.slane %v502_v16, 2 }
 0x1e2   : > { %v504_v20 = vadd.f32 %v503_v19, %v502_v16 }
 0x1e4   : > { %v505_v9 = vrot.slane %v504_v20, 1 }
 0x1e6   : > { %v506_v21 = vadd.f32 %v505_v9, %v504_v20 }
 0x1e8   : > { %v507_v22 = vadd.f32 %v506_v21, %v1095_v34 }
 0x1ea   : > { %508 = vst.msk [vmem:[#allocation2] sm:$0x1] %vm497_vm0, %v507_v22 }
 0x23c   : > { %v473_v3 = vpop.permute.xlu1 %472 }
 0x240   : > { %v457_v10 = vpop.permute.xlu1 %456 }
 0x241   : > { %v475_v12 = vsel %vm469_vm13, %v473_v3, %v457_v10 }
 0x242   : > { %v477_v13 = vsel %vm476_vm14, 0.0, %v475_v12 }
 0x243   : > { %v478_v15 = vsub.f32 %v455_v1, %v477_v13 }
 0x245   : > { %v485_v17 = vmul.f32 %v484_v14, %v478_v15 }
 0x247   : > { %v486_v18 = vmul.f32 %v1036_v6, %v485_v17 }
 0x249   : > { %488 = vadd.xlane.f32.xlu1 %v486_v18 }
 0x2d2   : > { %v489_v7 = vpop.xlane.xlu1 %488 }
 0x2d3   : > { %v490_v23 = vrot.slane %v489_v7, 4 }
 0x2d5   : > { %v491_v24 = vadd.f32 %v490_v23, %v489_v7 }
 0x2d7   : > { %v492_v25 = vrot.slane %v491_v24, 2 }
 0x2d9   : > { %v493_v26 = vadd.f32 %v492_v25, %v491_v24 }
 0x2db   : > { %v494_v27 = vrot.slane %v493_v26, 1 }
 0x2dd   : > { %v495_v6 = vadd.f32 %v494_v27, %v493_v26 }
 0x2df   : > { %v496_v29 = vadd.f32 %v495_v6, %v487_v28 }
 0x2e1   : > { %498 = vst.msk [vmem:[#allocation9] sm:$0x1] %vm497_vm0, %v496_v29 }
 0x2e2   : > { %811 = shalt.err (!%p808_p0)
}
 0x2e3   : > { %682 = dma.vmem_to_hbm [thread:$0]  (%p693_p8), %s517_s29, 16, %s1136_s3, [#allocation6]  }
 0x2e4   : > { %847 = dma.done.wait (%p693_p8), [#allocation6], 16  }
 0x2e5   : > { %849 = vsyncadd (%p693_p8), [#allocation6], 4294967280 }
 0x2e6 PF: > { %p19_p2 = scmp.ge.s32.totalorder %s920_s18, 4   ;;  %s1145_s14 = smov %s856_s15 }
 0x2e7   : > { %s1146_s15 = smov %s860_s16  ;;  %s1147_s16 = smov %s930_s21 }
 0x2e8   : > { %s1148_s17 = smov %s920_s18  ;;  %21 = sbr.rel (!%p19_p2) target bundleno = 9 (0x9), region = 86 }
 0x2ed   :  { %529 = vsyncpa [#allocation5], 1 }
 0x2ee   :  { %531 = vsyncpa [#allocation5 + $0x1], 1 }
 0x2ef   :  { %532 = vsyncpa [#allocation8], 1 }
 0x2f0   :  { %534 = vsyncpa [#allocation8 + $0x1], 1 }
 0x2f1   :  { %535 = vsyncpa [#allocation6], 1 }
 0x2f2   :  { %537 = vsyncpa [#allocation6 + $0x1], 1 }

</bundles_post_ra>
